<compile_context>
chip_gen: v7x
topology: tpu7x:2x2x1
jax: 0.10.0
libtpu: 0.0.40
codegen_flags: <defaults>
</compile_context>

<pallas_src>
import functools

import jax
import jax.numpy as jnp
from jax.experimental import pallas as pl
from jax.experimental.pallas import tpu as pltpu


def rnn_chunk_kernel(*refs, num_layers, time_block, compute_dtype):
    # Ref layout (num_layers > 1):
    #   proj0 [time_block,TB,H] cd | lens [TB,1] i32 | b0 [1,H] f32 | whh0 [H,H] cd |
    #   wcat [L-1,2H,H] cd | brest [L-1,1,H] f32 | wfc [1,H] f32 | bfc [1,1] f32 |
    #   out [1,TB] f32 | h_scratch [L,TB,H] f32
    if num_layers > 1:
        (proj0_ref, len_ref, b0_ref, whh0_ref, wcat_ref, brest_ref,
         wfc_ref, bfc_ref, out_ref, h_ref) = refs
    else:
        (proj0_ref, len_ref, b0_ref, whh0_ref,
         wfc_ref, bfc_ref, out_ref, h_ref) = refs

    t_blk = pl.program_id(1)
    _, tb, hsz = h_ref.shape

    @pl.when(t_blk == 0)
    def _():
        h_ref[...] = jnp.zeros_like(h_ref)

    lens = len_ref[...]                                        # [TB, 1] int32
    whh0 = whh0_ref[...]                                       # resident, loaded once
    b0 = jnp.broadcast_to(b0_ref[...], (tb, hsz))              # hoisted bias broadcast
    if num_layers > 1:
        wcats = [wcat_ref[l - 1] for l in range(1, num_layers)]
        biases = [jnp.broadcast_to(brest_ref[l - 1], (tb, hsz))
                  for l in range(1, num_layers)]

    # f32 state for precision + compute-dtype copies for MXU operands
    h = [h_ref[l] for l in range(num_layers)]                  # [TB, H] f32
    hc = [h[l].astype(compute_dtype) for l in range(num_layers)]

    # statically unrolled chunk of the serial recurrence
    for i in range(time_block):
        t = t_blk * time_block + i
        # hoist the freeze-mask broadcast once per step, reused by every layer
        m = jnp.broadcast_to(t < lens, (tb, hsz))

        # layer 0: streamed pre-projected input + recurrent term + bias (in-kernel)
        z0 = (proj0_ref[i].astype(jnp.float32)
              + jnp.dot(hc[0], whh0, preferred_element_type=jnp.float32)
              + b0)
        hn = jnp.where(m, jnp.tanh(z0), h[0])
        h[0] = hn
        hc[0] = hn.astype(compute_dtype)
        xc = hc[0]

        # layers 1..L-1: fused matmul concat([x, h]) @ [W_ih ; W_hh], concat in bf16
        for l in range(1, num_layers):
            xin = jnp.concatenate([xc, hc[l]], axis=1)                     # [TB, 2H] cd
            z = jnp.dot(xin, wcats[l - 1],
                        preferred_element_type=jnp.float32) + biases[l - 1]
            hn = jnp.where(m, jnp.tanh(z), h[l])
            h[l] = hn
            hc[l] = hn.astype(compute_dtype)
            xc = hc[l]

    # persist hidden state for the next time chunk
    for l in range(num_layers):
        h_ref[l] = h[l]

    @pl.when(t_blk == pl.num_programs(1) - 1)
    def _():
        # final Linear(H, 1): VPU multiply + lane reduce (avoid an N=1 MXU matmul);
        # lane-dense (1, TB) output block.
        scores = jnp.sum(h[num_layers - 1] * wfc_ref[...], axis=-1)        # [TB]
        out_ref[...] = scores[None, :] + bfc_ref[...]


def rnn_model_forward(inputs, text_lengths, params, *, num_layers,
                      batch_block=None, time_block=8, compute_dtype=None):
    """inputs: [B, T] int32 token ids; text_lengths: [B] int. Returns [B] f32."""
    if compute_dtype is None:
        # bf16 MXU operands on real TPU; f32 elsewhere (CPU/interpret has no bf16 dot).
        compute_dtype = jnp.bfloat16 if jax.default_backend() == "tpu" else jnp.float32

    emb_w = params["embedding"]
    B, T = inputs.shape
    H = params["whh"].shape[-1]
    L = num_layers

    if batch_block is None:
        # NOTE: for production shapes pick TB as a multiple of 8 (ideally 128-512), pad
        # H to a multiple of 128, and keep B // TB >= 2 so both v7x TensorCores work.
        batch_block = B
    assert B % batch_block == 0
    TB = batch_block

    time_block = max(1, min(time_block, T))
    T_pad = pl.cdiv(T, time_block) * time_block
    n_tblk = T_pad // time_block

    # Pad the tiny [B, T] token ids (not the big projection); padded steps are frozen by
    # the length mask (t >= len) so token id 0 is harmless.
    ids = inputs.astype(jnp.int32)
    if T_pad != T:
        ids = jnp.pad(ids, ((0, 0), (0, T_pad - T)))

    # Gather time-major so the hoisted GEMM writes [T, B, H] contiguously (no transpose).
    embedded_tm = jnp.take(emb_w, ids.T, axis=0).astype(compute_dtype)     # [T_pad, B, E]

    # Hoisted layer-0 input projection: ONE large MXU-friendly GEMM; streamed to the
    # kernel in compute_dtype (bf16 on TPU).  Bias is added inside the kernel.
    proj0 = jnp.einsum("tbe,eh->tbh", embedded_tm,
                       params["wih0"].astype(compute_dtype),
                       preferred_element_type=jnp.float32
                       ).astype(compute_dtype)                             # [T_pad, B, H]

    lens = text_lengths.astype(jnp.int32).reshape(B, 1)

    # --- weight packing ------------------------------------------------------------
    b0 = (params["bih"][0] + params["bhh"][0]).reshape(1, H).astype(jnp.float32)
    whh0 = params["whh"][0].astype(compute_dtype)                          # [H, H]
    wfc_row = params["wfc"].reshape(1, H).astype(jnp.float32)              # [1, H]
    bfc = params["bfc"].reshape(1, 1).astype(jnp.float32)                  # [1, 1]

    kernel = functools.partial(rnn_chunk_kernel, num_layers=L,
                               time_block=time_block, compute_dtype=compute_dtype)

    in_specs = [
        pl.BlockSpec((time_block, TB, H), lambda b, t: (t, b, 0)),   # streamed proj0
        pl.BlockSpec((TB, 1), lambda b, t: (b, 0)),                  # lengths
        pl.BlockSpec((1, H), lambda b, t: (0, 0)),                   # layer-0 summed bias
        pl.BlockSpec((H, H), lambda b, t: (0, 0)),                   # whh[0] (resident)
    ]
    args = [proj0, lens, b0, whh0]

    wcat_size = 0
    if L > 1:
        Lm1 = L - 1
        wcat = jnp.concatenate([params["wih_rest"][:Lm1], params["whh"][1:]],
                               axis=1).astype(compute_dtype)               # [L-1, 2H, H]
        brest = (params["bih"][1:] + params["bhh"][1:])[:, None, :].astype(jnp.float32)
        in_specs += [
            pl.BlockSpec((Lm1, 2 * H, H), lambda b, t: (0, 0, 0)),   # fused Wih|Whh
            pl.BlockSpec((Lm1, 1, H), lambda b, t: (0, 0, 0)),       # summed biases
        ]
        args += [wcat, brest]
        wcat_size = wcat.size

    in_specs += [
        pl.BlockSpec((1, H), lambda b, t: (0, 0)),                   # fc weight row
        pl.BlockSpec((1, 1), lambda b, t: (0, 0)),                   # fc bias
    ]
    args += [wfc_row, bfc]

    # Scoped-VMEM budget: resident weights + double-buffered proj0 chunk + f32 scratch.
    cbytes = jnp.dtype(compute_dtype).itemsize
    est = (whh0.size * cbytes + wcat_size * cbytes
           + (L - 1) * H * 4 + 2 * H * 4 + 4
           + 2 * time_block * TB * H * cbytes                        # proj0 double buffer
           + TB * 8
           + L * TB * H * 4)                                         # hidden scratch
    # 48 MiB cap leaves headroom on v7x (64 MiB physical); v5e/v6e (128 MiB) can raise
    # this and time_block if the grid-step overhead shows up in profiles.
    vmem_limit = int(min(48 * 1024 * 1024, max(16 * 1024 * 1024, 2 * est)))

    out = pl.pallas_call(
        kernel,
        out_shape=jax.ShapeDtypeStruct((1, B), jnp.float32),
        grid_spec=pltpu.PrefetchScalarGridSpec(
            num_scalar_prefetch=0,
            grid=(B // TB, n_tblk),                 # (batch tiles, time chunks)
            in_specs=in_specs,
            out_specs=pl.BlockSpec((1, TB), lambda b, t: (0, b)),
            scratch_shapes=[pltpu.VMEM((L, TB, H), jnp.float32)],
        ),
        compiler_params=pltpu.CompilerParams(
            dimension_semantics=("parallel", "arbitrary"),
            vmem_limit_bytes=vmem_limit),
    )(*args)
    return out[0]


def init_params(key, vocab_size, embedding_dim, hidden_size, num_layers):
    ks = jax.random.split(key, 9)
    bound = 1.0 / jnp.sqrt(jnp.float32(hidden_size))
    u = lambda k, shape: jax.random.uniform(k, shape, jnp.float32, -bound, bound)
    return {
        "embedding": jax.random.normal(ks[0], (vocab_size, embedding_dim), jnp.float32),
        "wih0": u(ks[1], (embedding_dim, hidden_size)),
        "wih_rest": u(ks[2], (max(num_layers - 1, 1), hidden_size, hidden_size)),
        "whh": u(ks[3], (num_layers, hidden_size, hidden_size)),
        "bih": u(ks[4], (num_layers, hidden_size)),
        "bhh": u(ks[5], (num_layers, hidden_size)),
        "wfc": u(ks[6], (hidden_size, 1)),
        "bfc": u(ks[7], (1, 1)),
    }


def rnn_model_reference(inputs, text_lengths, params, *, num_layers,
                        compute_dtype=jnp.float32):
    """Pure-JAX, unfused per-timestep reference with matching matmul operand precision."""
    cd = compute_dtype
    embedded = jnp.take(params["embedding"], inputs, axis=0)   # [B, T, E]
    B, T, _ = embedded.shape
    H = params["whh"].shape[-1]
    h = jnp.zeros((num_layers, B, H), jnp.float32)
    for t in range(T):
        x = embedded[:, t, :]
        mask = (t < text_lengths)[:, None]
        new = []
        for l in range(num_layers):
            w_in = params["wih0"] if l == 0 else params["wih_rest"][l - 1]
            z = (jnp.dot(x.astype(cd), w_in.astype(cd),
                         preferred_element_type=jnp.float32)
                 + jnp.dot(h[l].astype(cd), params["whh"][l].astype(cd),
                           preferred_element_type=jnp.float32)
                 + params["bih"][l] + params["bhh"][l])
            hn = jnp.tanh(z)
            hn = jnp.where(mask, hn, h[l])
            new.append(hn)
            x = hn
        h = jnp.stack(new, axis=0)
    return (h[num_layers - 1] @ params["wfc"] + params["bfc"])[:, 0]


if __name__ == "__main__":
    B, T = 2, 8
    VOCAB, EMB_DIM, HIDDEN, NUM_LAYERS = 20, 32, 32, 2

    key = jax.random.PRNGKey(0)
    k_par, k_tok = jax.random.split(key)

    params = init_params(k_par, VOCAB, EMB_DIM, HIDDEN, NUM_LAYERS)
    inputs = jax.random.randint(k_tok, (B, T), 0, VOCAB, dtype=jnp.int32)
    text_lengths = jnp.array([T, 5], dtype=jnp.int32)   # second sequence is padded

    # bf16 operands on a real TPU (MXU native); f32 on non-TPU backends.
    cd = jnp.bfloat16 if jax.default_backend() == "tpu" else jnp.float32

    out = rnn_model_forward(inputs, text_lengths, params,
                            num_layers=NUM_LAYERS, compute_dtype=cd)
    out = jax.block_until_ready(out)

    ref = rnn_model_reference(inputs, text_lengths, params,
                              num_layers=NUM_LAYERS, compute_dtype=cd)
    tol = 5e-2 if cd == jnp.bfloat16 else 1e-4
    assert out.shape == (B,)
    assert jnp.allclose(out, ref, rtol=tol, atol=tol), (out, ref)

    print("KERNEL_OK")
</pallas_src>

<mosaic_0001>
module attributes {stable_mosaic.version = 11 : i64} {
  func.func @rnn_chunk_kernel(%arg0: i32, %arg1: i32, %arg2: memref<8x2x32xf32, #tpu.memory_space<vmem>>, %arg3: memref<2x1xi32, #tpu.memory_space<vmem>>, %arg4: memref<1x32xf32, #tpu.memory_space<vmem>>, %arg5: memref<32x32xf32, #tpu.memory_space<vmem>>, %arg6: memref<1x64x32xf32, #tpu.memory_space<vmem>>, %arg7: memref<1x1x32xf32, #tpu.memory_space<vmem>>, %arg8: memref<1x32xf32, #tpu.memory_space<vmem>>, %arg9: memref<1x1xf32, #tpu.memory_space<vmem>>, %arg10: memref<1x2xf32, #tpu.memory_space<vmem>>, %arg11: memref<2x2x32xf32, #tpu.memory_space<vmem>>) attributes {dimension_semantics = [#tpu.dimension_semantics<parallel>, #tpu.dimension_semantics<arbitrary>], iteration_bounds = array<i64: 1, 1>, scalar_prefetch = 0 : i64, scratch_operands = 1 : i64, tpu.core_type = #tpu.core_type<tc>, window_params = [{transform_indices = @transform_0, window_bounds = array<i64: 8, 2, 32>}, {transform_indices = @transform_1, window_bounds = array<i64: 2, 1>}, {pipeline_mode = #tpu.pipeline_mode<synchronous>, transform_indices = @transform_2, window_bounds = array<i64: 1, 32>}, {pipeline_mode = #tpu.pipeline_mode<synchronous>, transform_indices = @transform_3, window_bounds = array<i64: 32, 32>}, {pipeline_mode = #tpu.pipeline_mode<synchronous>, transform_indices = @transform_4, window_bounds = array<i64: 1, 64, 32>}, {pipeline_mode = #tpu.pipeline_mode<synchronous>, transform_indices = @transform_5, window_bounds = array<i64: 1, 1, 32>}, {pipeline_mode = #tpu.pipeline_mode<synchronous>, transform_indices = @transform_6, window_bounds = array<i64: 1, 32>}, {pipeline_mode = #tpu.pipeline_mode<synchronous>, transform_indices = @transform_7, window_bounds = array<i64: 1, 1>}, {transform_indices = @transform_8, window_bounds = array<i64: 1, 2>}]} {
    %c0_i32 = arith.constant 0 : i32
    %0 = arith.cmpi eq, %arg1, %c0_i32 : i32
    %1 = arith.extui %0 : i1 to i32
    %c0_i32_0 = arith.constant 0 : i32
    %2 = arith.cmpi ne, %1, %c0_i32_0 : i32
    scf.if %2 {
      %cst_66 = arith.constant 0.000000e+00 : f32
      %171 = vector.broadcast %cst_66 : f32 to vector<2x2x32xf32>
      %c0_67 = arith.constant 0 : index
      %c0_68 = arith.constant 0 : index
      %c0_69 = arith.constant 0 : index
      %172 = vector.load %arg11[%c0_67, %c0_68, %c0_69] : memref<2x2x32xf32, #tpu.memory_space<vmem>>, vector<2x2x32xf32>
      tpu.vector_store %arg11[%c0_67, %c0_68, %c0_69], %171 {strides = array<i32>} : memref<2x2x32xf32, #tpu.memory_space<vmem>>, vector<2x2x32xf32>,
    } else {
    }
    %c0 = arith.constant 0 : index
    %c0_1 = arith.constant 0 : index
    %3 = vector.load %arg3[%c0, %c0_1] : memref<2x1xi32, #tpu.memory_space<vmem>>, vector<2x1xi32>
    %c0_2 = arith.constant 0 : index
    %c0_3 = arith.constant 0 : index
    %4 = vector.load %arg5[%c0_2, %c0_3] : memref<32x32xf32, #tpu.memory_space<vmem>>, vector<32x32xf32>
    %c0_4 = arith.constant 0 : index
    %c0_5 = arith.constant 0 : index
    %5 = vector.load %arg4[%c0_4, %c0_5] : memref<1x32xf32, #tpu.memory_space<vmem>>, vector<1x32xf32>
    %6 = vector.shape_cast %5 : vector<1x32xf32> to vector<1x32xf32>
    %7 = vector.broadcast %6 : vector<1x32xf32> to vector<2x32xf32>
    %c0_6 = arith.constant 0 : index
    %c0_7 = arith.constant 0 : index
    %c0_8 = arith.constant 0 : index
    %8 = vector.load %arg6[%c0_6, %c0_7, %c0_8] : memref<1x64x32xf32, #tpu.memory_space<vmem>>, vector<1x64x32xf32>
    %9 = vector.shape_cast %8 : vector<1x64x32xf32> to vector<64x32xf32>
    %c0_9 = arith.constant 0 : index
    %c0_10 = arith.constant 0 : index
    %c0_11 = arith.constant 0 : index
    %10 = vector.load %arg7[%c0_9, %c0_10, %c0_11] : memref<1x1x32xf32, #tpu.memory_space<vmem>>, vector<1x1x32xf32>
    %11 = vector.shape_cast %10 : vector<1x1x32xf32> to vector<1x32xf32>
    %12 = vector.shape_cast %11 : vector<1x32xf32> to vector<1x32xf32>
    %13 = vector.broadcast %12 : vector<1x32xf32> to vector<2x32xf32>
    %c0_12 = arith.constant 0 : index
    %c0_13 = arith.constant 0 : index
    %c0_14 = arith.constant 0 : index
    %14 = vector.load %arg11[%c0_12, %c0_13, %c0_14] : memref<2x2x32xf32, #tpu.memory_space<vmem>>, vector<1x2x32xf32>
    %15 = vector.shape_cast %14 : vector<1x2x32xf32> to vector<2x32xf32>
    %c1 = arith.constant 1 : index
    %c0_15 = arith.constant 0 : index
    %c0_16 = arith.constant 0 : index
    %16 = vector.load %arg11[%c1, %c0_15, %c0_16] : memref<2x2x32xf32, #tpu.memory_space<vmem>>, vector<1x2x32xf32>
    %17 = vector.shape_cast %16 : vector<1x2x32xf32> to vector<2x32xf32>
    %c8_i32 = arith.constant 8 : i32
    %18 = arith.muli %arg1, %c8_i32 : i32
    %c0_i32_17 = arith.constant 0 : i32
    %19 = arith.addi %18, %c0_i32_17 : i32
    %20 = vector.broadcast %19 : i32 to vector<2x1xi32>
    %21 = arith.cmpi slt, %20, %3 : vector<2x1xi32>
    %22 = vector.shape_cast %21 : vector<2x1xi1> to vector<2x1xi1>
    %23 = vector.broadcast %22 : vector<2x1xi1> to vector<2x32xi1>
    %c0_18 = arith.constant 0 : index
    %c0_19 = arith.constant 0 : index
    %c0_20 = arith.constant 0 : index
    %24 = vector.load %arg2[%c0_18, %c0_19, %c0_20] : memref<8x2x32xf32, #tpu.memory_space<vmem>>, vector<1x2x32xf32>
    %25 = vector.shape_cast %24 : vector<1x2x32xf32> to vector<2x32xf32>
    %cst = arith.constant dense<0.000000e+00> : vector<2x32xf32>
    %26 = tpu.matmul %15, %4, %cst {dimension_numbers = #tpu.dot_dimension_numbers<[1], [0], [0], [1], [0, 0, 1, 1], [], []>} : vector<2x32xf32>, vector<32x32xf32>, vector<2x32xf32> -> vector<2x32xf32>
    %27 = arith.addf %25, %26 : vector<2x32xf32>
    %28 = arith.addf %27, %7 : vector<2x32xf32>
    %29 = math.tanh %28 : vector<2x32xf32>
    %30 = arith.select %23, %29, %15 : vector<2x32xi1>, vector<2x32xf32>
    %31 = tpu.concatenate %30, %17 in 1 : vector<2x32xf32>, vector<2x32xf32> -> vector<2x64xf32>
    %cst_21 = arith.constant dense<0.000000e+00> : vector<2x32xf32>
    %32 = tpu.matmul %31, %9, %cst_21 {dimension_numbers = #tpu.dot_dimension_numbers<[1], [0], [0], [1], [0, 0, 1, 1], [], []>} : vector<2x64xf32>, vector<64x32xf32>, vector<2x32xf32> -> vector<2x32xf32>
    %33 = arith.addf %32, %13 : vector<2x32xf32>
    %34 = math.tanh %33 : vector<2x32xf32>
    %35 = arith.select %23, %34, %17 : vector<2x32xi1>, vector<2x32xf32>
    %c8_i32_22 = arith.constant 8 : i32
    %36 = arith.muli %arg1, %c8_i32_22 : i32
    %c1_i32 = arith.constant 1 : i32
    %37 = arith.addi %36, %c1_i32 : i32
    %38 = vector.broadcast %37 : i32 to vector<2x1xi32>
    %39 = arith.cmpi slt, %38, %3 : vector<2x1xi32>
    %40 = vector.shape_cast %39 : vector<2x1xi1> to vector<2x1xi1>
    %41 = vector.broadcast %40 : vector<2x1xi1> to vector<2x32xi1>
    %c1_23 = arith.constant 1 : index
    %c0_24 = arith.constant 0 : index
    %c0_25 = arith.constant 0 : index
    %42 = vector.load %arg2[%c1_23, %c0_24, %c0_25] : memref<8x2x32xf32, #tpu.memory_space<vmem>>, vector<1x2x32xf32>
    %43 = vector.shape_cast %42 : vector<1x2x32xf32> to vector<2x32xf32>
    %cst_26 = arith.constant dense<0.000000e+00> : vector<2x32xf32>
    %44 = tpu.matmul %30, %4, %cst_26 {dimension_numbers = #tpu.dot_dimension_numbers<[1], [0], [0], [1], [0, 0, 1, 1], [], []>} : vector<2x32xf32>, vector<32x32xf32>, vector<2x32xf32> -> vector<2x32xf32>
    %45 = arith.addf %43, %44 : vector<2x32xf32>
    %46 = arith.addf %45, %7 : vector<2x32xf32>
    %47 = math.tanh %46 : vector<2x32xf32>
    %48 = arith.select %41, %47, %30 : vector<2x32xi1>, vector<2x32xf32>
    %49 = tpu.concatenate %48, %35 in 1 : vector<2x32xf32>, vector<2x32xf32> -> vector<2x64xf32>
    %cst_27 = arith.constant dense<0.000000e+00> : vector<2x32xf32>
    %50 = tpu.matmul %49, %9, %cst_27 {dimension_numbers = #tpu.dot_dimension_numbers<[1], [0], [0], [1], [0, 0, 1, 1], [], []>} : vector<2x64xf32>, vector<64x32xf32>, vector<2x32xf32> -> vector<2x32xf32>
    %51 = arith.addf %50, %13 : vector<2x32xf32>
    %52 = math.tanh %51 : vector<2x32xf32>
    %53 = arith.select %41, %52, %35 : vector<2x32xi1>, vector<2x32xf32>
    %c8_i32_28 = arith.constant 8 : i32
    %54 = arith.muli %arg1, %c8_i32_28 : i32
    %c2_i32 = arith.constant 2 : i32
    %55 = arith.addi %54, %c2_i32 : i32
    %56 = vector.broadcast %55 : i32 to vector<2x1xi32>
    %57 = arith.cmpi slt, %56, %3 : vector<2x1xi32>
    %58 = vector.shape_cast %57 : vector<2x1xi1> to vector<2x1xi1>
    %59 = vector.broadcast %58 : vector<2x1xi1> to vector<2x32xi1>
    %c2 = arith.constant 2 : index
    %c0_29 = arith.constant 0 : index
    %c0_30 = arith.constant 0 : index
    %60 = vector.load %arg2[%c2, %c0_29, %c0_30] : memref<8x2x32xf32, #tpu.memory_space<vmem>>, vector<1x2x32xf32>
    %61 = vector.shape_cast %60 : vector<1x2x32xf32> to vector<2x32xf32>
    %cst_31 = arith.constant dense<0.000000e+00> : vector<2x32xf32>
    %62 = tpu.matmul %48, %4, %cst_31 {dimension_numbers = #tpu.dot_dimension_numbers<[1], [0], [0], [1], [0, 0, 1, 1], [], []>} : vector<2x32xf32>, vector<32x32xf32>, vector<2x32xf32> -> vector<2x32xf32>
    %63 = arith.addf %61, %62 : vector<2x32xf32>
    %64 = arith.addf %63, %7 : vector<2x32xf32>
    %65 = math.tanh %64 : vector<2x32xf32>
    %66 = arith.select %59, %65, %48 : vector<2x32xi1>, vector<2x32xf32>
    %67 = tpu.concatenate %66, %53 in 1 : vector<2x32xf32>, vector<2x32xf32> -> vector<2x64xf32>
    %cst_32 = arith.constant dense<0.000000e+00> : vector<2x32xf32>
    %68 = tpu.matmul %67, %9, %cst_32 {dimension_numbers = #tpu.dot_dimension_numbers<[1], [0], [0], [1], [0, 0, 1, 1], [], []>} : vector<2x64xf32>, vector<64x32xf32>, vector<2x32xf32> -> vector<2x32xf32>
    %69 = arith.addf %68, %13 : vector<2x32xf32>
    %70 = math.tanh %69 : vector<2x32xf32>
    %71 = arith.select %59, %70, %53 : vector<2x32xi1>, vector<2x32xf32>
    %c8_i32_33 = arith.constant 8 : i32
    %72 = arith.muli %arg1, %c8_i32_33 : i32
    %c3_i32 = arith.constant 3 : i32
    %73 = arith.addi %72, %c3_i32 : i32
    %74 = vector.broadcast %73 : i32 to vector<2x1xi32>
    %75 = arith.cmpi slt, %74, %3 : vector<2x1xi32>
    %76 = vector.shape_cast %75 : vector<2x1xi1> to vector<2x1xi1>
    %77 = vector.broadcast %76 : vector<2x1xi1> to vector<2x32xi1>
    %c3 = arith.constant 3 : index
    %c0_34 = arith.constant 0 : index
    %c0_35 = arith.constant 0 : index
    %78 = vector.load %arg2[%c3, %c0_34, %c0_35] : memref<8x2x32xf32, #tpu.memory_space<vmem>>, vector<1x2x32xf32>
    %79 = vector.shape_cast %78 : vector<1x2x32xf32> to vector<2x32xf32>
    %cst_36 = arith.constant dense<0.000000e+00> : vector<2x32xf32>
    %80 = tpu.matmul %66, %4, %cst_36 {dimension_numbers = #tpu.dot_dimension_numbers<[1], [0], [0], [1], [0, 0, 1, 1], [], []>} : vector<2x32xf32>, vector<32x32xf32>, vector<2x32xf32> -> vector<2x32xf32>
    %81 = arith.addf %79, %80 : vector<2x32xf32>
    %82 = arith.addf %81, %7 : vector<2x32xf32>
    %83 = math.tanh %82 : vector<2x32xf32>
    %84 = arith.select %77, %83, %66 : vector<2x32xi1>, vector<2x32xf32>
    %85 = tpu.concatenate %84, %71 in 1 : vector<2x32xf32>, vector<2x32xf32> -> vector<2x64xf32>
    %cst_37 = arith.constant dense<0.000000e+00> : vector<2x32xf32>
    %86 = tpu.matmul %85, %9, %cst_37 {dimension_numbers = #tpu.dot_dimension_numbers<[1], [0], [0], [1], [0, 0, 1, 1], [], []>} : vector<2x64xf32>, vector<64x32xf32>, vector<2x32xf32> -> vector<2x32xf32>
    %87 = arith.addf %86, %13 : vector<2x32xf32>
    %88 = math.tanh %87 : vector<2x32xf32>
    %89 = arith.select %77, %88, %71 : vector<2x32xi1>, vector<2x32xf32>
    %c8_i32_38 = arith.constant 8 : i32
    %90 = arith.muli %arg1, %c8_i32_38 : i32
    %c4_i32 = arith.constant 4 : i32
    %91 = arith.addi %90, %c4_i32 : i32
    %92 = vector.broadcast %91 : i32 to vector<2x1xi32>
    %93 = arith.cmpi slt, %92, %3 : vector<2x1xi32>
    %94 = vector.shape_cast %93 : vector<2x1xi1> to vector<2x1xi1>
    %95 = vector.broadcast %94 : vector<2x1xi1> to vector<2x32xi1>
    %c4 = arith.constant 4 : index
    %c0_39 = arith.constant 0 : index
    %c0_40 = arith.constant 0 : index
    %96 = vector.load %arg2[%c4, %c0_39, %c0_40] : memref<8x2x32xf32, #tpu.memory_space<vmem>>, vector<1x2x32xf32>
    %97 = vector.shape_cast %96 : vector<1x2x32xf32> to vector<2x32xf32>
    %cst_41 = arith.constant dense<0.000000e+00> : vector<2x32xf32>
    %98 = tpu.matmul %84, %4, %cst_41 {dimension_numbers = #tpu.dot_dimension_numbers<[1], [0], [0], [1], [0, 0, 1, 1], [], []>} : vector<2x32xf32>, vector<32x32xf32>, vector<2x32xf32> -> vector<2x32xf32>
    %99 = arith.addf %97, %98 : vector<2x32xf32>
    %100 = arith.addf %99, %7 : vector<2x32xf32>
    %101 = math.tanh %100 : vector<2x32xf32>
    %102 = arith.select %95, %101, %84 : vector<2x32xi1>, vector<2x32xf32>
    %103 = tpu.concatenate %102, %89 in 1 : vector<2x32xf32>, vector<2x32xf32> -> vector<2x64xf32>
    %cst_42 = arith.constant dense<0.000000e+00> : vector<2x32xf32>
    %104 = tpu.matmul %103, %9, %cst_42 {dimension_numbers = #tpu.dot_dimension_numbers<[1], [0], [0], [1], [0, 0, 1, 1], [], []>} : vector<2x64xf32>, vector<64x32xf32>, vector<2x32xf32> -> vector<2x32xf32>
    %105 = arith.addf %104, %13 : vector<2x32xf32>
    %106 = math.tanh %105 : vector<2x32xf32>
    %107 = arith.select %95, %106, %89 : vector<2x32xi1>, vector<2x32xf32>
    %c8_i32_43 = arith.constant 8 : i32
    %108 = arith.muli %arg1, %c8_i32_43 : i32
    %c5_i32 = arith.constant 5 : i32
    %109 = arith.addi %108, %c5_i32 : i32
    %110 = vector.broadcast %109 : i32 to vector<2x1xi32>
    %111 = arith.cmpi slt, %110, %3 : vector<2x1xi32>
    %112 = vector.shape_cast %111 : vector<2x1xi1> to vector<2x1xi1>
    %113 = vector.broadcast %112 : vector<2x1xi1> to vector<2x32xi1>
    %c5 = arith.constant 5 : index
    %c0_44 = arith.constant 0 : index
    %c0_45 = arith.constant 0 : index
    %114 = vector.load %arg2[%c5, %c0_44, %c0_45] : memref<8x2x32xf32, #tpu.memory_space<vmem>>, vector<1x2x32xf32>
    %115 = vector.shape_cast %114 : vector<1x2x32xf32> to vector<2x32xf32>
    %cst_46 = arith.constant dense<0.000000e+00> : vector<2x32xf32>
    %116 = tpu.matmul %102, %4, %cst_46 {dimension_numbers = #tpu.dot_dimension_numbers<[1], [0], [0], [1], [0, 0, 1, 1], [], []>} : vector<2x32xf32>, vector<32x32xf32>, vector<2x32xf32> -> vector<2x32xf32>
    %117 = arith.addf %115, %116 : vector<2x32xf32>
    %118 = arith.addf %117, %7 : vector<2x32xf32>
    %119 = math.tanh %118 : vector<2x32xf32>
    %120 = arith.select %113, %119, %102 : vector<2x32xi1>, vector<2x32xf32>
    %121 = tpu.concatenate %120, %107 in 1 : vector<2x32xf32>, vector<2x32xf32> -> vector<2x64xf32>
    %cst_47 = arith.constant dense<0.000000e+00> : vector<2x32xf32>
    %122 = tpu.matmul %121, %9, %cst_47 {dimension_numbers = #tpu.dot_dimension_numbers<[1], [0], [0], [1], [0, 0, 1, 1], [], []>} : vector<2x64xf32>, vector<64x32xf32>, vector<2x32xf32> -> vector<2x32xf32>
    %123 = arith.addf %122, %13 : vector<2x32xf32>
    %124 = math.tanh %123 : vector<2x32xf32>
    %125 = arith.select %113, %124, %107 : vector<2x32xi1>, vector<2x32xf32>
    %c8_i32_48 = arith.constant 8 : i32
    %126 = arith.muli %arg1, %c8_i32_48 : i32
    %c6_i32 = arith.constant 6 : i32
    %127 = arith.addi %126, %c6_i32 : i32
    %128 = vector.broadcast %127 : i32 to vector<2x1xi32>
    %129 = arith.cmpi slt, %128, %3 : vector<2x1xi32>
    %130 = vector.shape_cast %129 : vector<2x1xi1> to vector<2x1xi1>
    %131 = vector.broadcast %130 : vector<2x1xi1> to vector<2x32xi1>
    %c6 = arith.constant 6 : index
    %c0_49 = arith.constant 0 : index
    %c0_50 = arith.constant 0 : index
    %132 = vector.load %arg2[%c6, %c0_49, %c0_50] : memref<8x2x32xf32, #tpu.memory_space<vmem>>, vector<1x2x32xf32>
    %133 = vector.shape_cast %132 : vector<1x2x32xf32> to vector<2x32xf32>
    %cst_51 = arith.constant dense<0.000000e+00> : vector<2x32xf32>
    %134 = tpu.matmul %120, %4, %cst_51 {dimension_numbers = #tpu.dot_dimension_numbers<[1], [0], [0], [1], [0, 0, 1, 1], [], []>} : vector<2x32xf32>, vector<32x32xf32>, vector<2x32xf32> -> vector<2x32xf32>
    %135 = arith.addf %133, %134 : vector<2x32xf32>
    %136 = arith.addf %135, %7 : vector<2x32xf32>
    %137 = math.tanh %136 : vector<2x32xf32>
    %138 = arith.select %131, %137, %120 : vector<2x32xi1>, vector<2x32xf32>
    %139 = tpu.concatenate %138, %125 in 1 : vector<2x32xf32>, vector<2x32xf32> -> vector<2x64xf32>
    %cst_52 = arith.constant dense<0.000000e+00> : vector<2x32xf32>
    %140 = tpu.matmul %139, %9, %cst_52 {dimension_numbers = #tpu.dot_dimension_numbers<[1], [0], [0], [1], [0, 0, 1, 1], [], []>} : vector<2x64xf32>, vector<64x32xf32>, vector<2x32xf32> -> vector<2x32xf32>
    %141 = arith.addf %140, %13 : vector<2x32xf32>
    %142 = math.tanh %141 : vector<2x32xf32>
    %143 = arith.select %131, %142, %125 : vector<2x32xi1>, vector<2x32xf32>
    %c8_i32_53 = arith.constant 8 : i32
    %144 = arith.muli %arg1, %c8_i32_53 : i32
    %c7_i32 = arith.constant 7 : i32
    %145 = arith.addi %144, %c7_i32 : i32
    %146 = vector.broadcast %145 : i32 to vector<2x1xi32>
    %147 = arith.cmpi slt, %146, %3 : vector<2x1xi32>
    %148 = vector.shape_cast %147 : vector<2x1xi1> to vector<2x1xi1>
    %149 = vector.broadcast %148 : vector<2x1xi1> to vector<2x32xi1>
    %c7 = arith.constant 7 : index
    %c0_54 = arith.constant 0 : index
    %c0_55 = arith.constant 0 : index
    %150 = vector.load %arg2[%c7, %c0_54, %c0_55] : memref<8x2x32xf32, #tpu.memory_space<vmem>>, vector<1x2x32xf32>
    %151 = vector.shape_cast %150 : vector<1x2x32xf32> to vector<2x32xf32>
    %cst_56 = arith.constant dense<0.000000e+00> : vector<2x32xf32>
    %152 = tpu.matmul %138, %4, %cst_56 {dimension_numbers = #tpu.dot_dimension_numbers<[1], [0], [0], [1], [0, 0, 1, 1], [], []>} : vector<2x32xf32>, vector<32x32xf32>, vector<2x32xf32> -> vector<2x32xf32>
    %153 = arith.addf %151, %152 : vector<2x32xf32>
    %154 = arith.addf %153, %7 : vector<2x32xf32>
    %155 = math.tanh %154 : vector<2x32xf32>
    %156 = arith.select %149, %155, %138 : vector<2x32xi1>, vector<2x32xf32>
    %157 = tpu.concatenate %156, %143 in 1 : vector<2x32xf32>, vector<2x32xf32> -> vector<2x64xf32>
    %cst_57 = arith.constant dense<0.000000e+00> : vector<2x32xf32>
    %158 = tpu.matmul %157, %9, %cst_57 {dimension_numbers = #tpu.dot_dimension_numbers<[1], [0], [0], [1], [0, 0, 1, 1], [], []>} : vector<2x64xf32>, vector<64x32xf32>, vector<2x32xf32> -> vector<2x32xf32>
    %159 = arith.addf %158, %13 : vector<2x32xf32>
    %160 = math.tanh %159 : vector<2x32xf32>
    %161 = arith.select %149, %160, %143 : vector<2x32xi1>, vector<2x32xf32>
    %c0_58 = arith.constant 0 : index
    %c0_59 = arith.constant 0 : index
    %c0_60 = arith.constant 0 : index
    %162 = vector.load %arg11[%c0_58, %c0_59, %c0_60] : memref<2x2x32xf32, #tpu.memory_space<vmem>>, vector<1x2x32xf32>
    %163 = vector.shape_cast %162 : vector<1x2x32xf32> to vector<2x32xf32>
    %164 = vector.shape_cast %156 : vector<2x32xf32> to vector<1x2x32xf32>
    tpu.vector_store %arg11[%c0_58, %c0_59, %c0_60], %164 {strides = array<i32>} : memref<2x2x32xf32, #tpu.memory_space<vmem>>, vector<1x2x32xf32>,
    %c1_61 = arith.constant 1 : index
    %c0_62 = arith.constant 0 : index
    %c0_63 = arith.constant 0 : index
    %165 = vector.load %arg11[%c1_61, %c0_62, %c0_63] : memref<2x2x32xf32, #tpu.memory_space<vmem>>, vector<1x2x32xf32>
    %166 = vector.shape_cast %165 : vector<1x2x32xf32> to vector<2x32xf32>
    %167 = vector.shape_cast %161 : vector<2x32xf32> to vector<1x2x32xf32>
    tpu.vector_store %arg11[%c1_61, %c0_62, %c0_63], %167 {strides = array<i32>} : memref<2x2x32xf32, #tpu.memory_space<vmem>>, vector<1x2x32xf32>,
    %c0_i32_64 = arith.constant 0 : i32
    %168 = arith.cmpi eq, %arg1, %c0_i32_64 : i32
    %169 = arith.extui %168 : i1 to i32
    %c0_i32_65 = arith.constant 0 : i32
    %170 = arith.cmpi ne, %169, %c0_i32_65 : i32
    scf.if %170 {
      %c0_66 = arith.constant 0 : index
      %c0_67 = arith.constant 0 : index
      %171 = vector.load %arg8[%c0_66, %c0_67] : memref<1x32xf32, #tpu.memory_space<vmem>>, vector<1x32xf32>
      %172 = vector.broadcast %171 : vector<1x32xf32> to vector<2x32xf32>
      %173 = arith.mulf %161, %172 : vector<2x32xf32>
      %cst_68 = arith.constant dense<0.000000e+00> : vector<2xf32>
      %174 = vector.multi_reduction <add>, %173, %cst_68 [1] : vector<2x32xf32> to vector<2xf32>
      %175 = vector.shape_cast %174 : vector<2xf32> to vector<1x2xf32>
      %c0_69 = arith.constant 0 : index
      %c0_70 = arith.constant 0 : index
      %176 = vector.load %arg9[%c0_69, %c0_70] : memref<1x1xf32, #tpu.memory_space<vmem>>, vector<1x1xf32>
      %177 = vector.broadcast %176 : vector<1x1xf32> to vector<1x2xf32>
      %178 = arith.addf %175, %177 : vector<1x2xf32>
      %c0_71 = arith.constant 0 : index
      %c0_72 = arith.constant 0 : index
      %179 = vector.load %arg10[%c0_71, %c0_72] : memref<1x2xf32, #tpu.memory_space<vmem>>, vector<1x2xf32>
      tpu.vector_store %arg10[%c0_71, %c0_72], %178 {strides = array<i32>} : memref<1x2xf32, #tpu.memory_space<vmem>>, vector<1x2xf32>,
    } else {
    }
    return
  }
  func.func @transform_0(%arg0: i32, %arg1: i32) -> (i32, i32, i32) {
    %c0_i32 = arith.constant 0 : i32
    %c0_i32_0 = arith.constant 0 : i32
    return %arg1, %arg0, %c0_i32 : i32, i32, i32
  }
  func.func @transform_1(%arg0: i32, %arg1: i32) -> (i32, i32) {
    %c0_i32 = arith.constant 0 : i32
    %c0_i32_0 = arith.constant 0 : i32
    return %arg0, %c0_i32 : i32, i32
  }
  func.func @transform_2(%arg0: i32, %arg1: i32) -> (i32, i32) {
    %c0_i32 = arith.constant 0 : i32
    %c0_i32_0 = arith.constant 0 : i32
    %c0_i32_1 = arith.constant 0 : i32
    return %c0_i32, %c0_i32_0 : i32, i32
  }
  func.func @transform_3(%arg0: i32, %arg1: i32) -> (i32, i32) {
    %c0_i32 = arith.constant 0 : i32
    %c0_i32_0 = arith.constant 0 : i32
    %c0_i32_1 = arith.constant 0 : i32
    return %c0_i32, %c0_i32_0 : i32, i32
  }
  func.func @transform_4(%arg0: i32, %arg1: i32) -> (i32, i32, i32) {
    %c0_i32 = arith.constant 0 : i32
    %c0_i32_0 = arith.constant 0 : i32
    %c0_i32_1 = arith.constant 0 : i32
    %c0_i32_2 = arith.constant 0 : i32
    return %c0_i32, %c0_i32_0, %c0_i32_1 : i32, i32, i32
  }
  func.func @transform_5(%arg0: i32, %arg1: i32) -> (i32, i32, i32) {
    %c0_i32 = arith.constant 0 : i32
    %c0_i32_0 = arith.constant 0 : i32
    %c0_i32_1 = arith.constant 0 : i32
    %c0_i32_2 = arith.constant 0 : i32
    return %c0_i32, %c0_i32_0, %c0_i32_1 : i32, i32, i32
  }
  func.func @transform_6(%arg0: i32, %arg1: i32) -> (i32, i32) {
    %c0_i32 = arith.constant 0 : i32
    %c0_i32_0 = arith.constant 0 : i32
    %c0_i32_1 = arith.constant 0 : i32
    return %c0_i32, %c0_i32_0 : i32, i32
  }
  func.func @transform_7(%arg0: i32, %arg1: i32) -> (i32, i32) {
    %c0_i32 = arith.constant 0 : i32
    %c0_i32_0 = arith.constant 0 : i32
    %c0_i32_1 = arith.constant 0 : i32
    return %c0_i32, %c0_i32_0 : i32, i32
  }
  func.func @transform_8(%arg0: i32, %arg1: i32) -> (i32, i32) {
    %c0_i32 = arith.constant 0 : i32
    %c0_i32_0 = arith.constant 0 : i32
    return %c0_i32, %arg0 : i32, i32
  }
}

</mosaic_0001>

<bundles_post_ra>
// kernel: tpu_custom_call.1
= control target key start
LH: loop header
LB: loop body
LE: loop exit
PB: predicated region body
PF: predicated region fallthrough
CT: control target
= control target key end

     0   :  { %s2429_s0 = inlined_call_operand.vmem [shape: f32[8,2,32], index: 0, kind: input, shape index: {}]   ;;  %s2430_s1 = inlined_call_operand.vmem [shape: s32[2,1], index: 1, kind: input, shape index: {}]   ;;  %s2431_s2 = inlined_call_operand.vmem [shape: f32[1,32], index: 2, kind: input, shape index: {}]   ;;  %s2432_s3 = inlined_call_operand.vmem [shape: f32[32,32], index: 3, kind: input, shape index: {}]   ;;  %s2433_s4 = inlined_call_operand.vmem [shape: f32[1,64,32], index: 4, kind: input, shape index: {}]   ;;  %s2434_s5 = inlined_call_operand.vmem [shape: f32[1,1,32], index: 5, kind: input, shape index: {}]   ;;  %s2435_s6 = inlined_call_operand.vmem [shape: f32[1,32], index: 6, kind: input, shape index: {}]   ;;  %s2436_s7 = inlined_call_operand.<no memory space> [shape: f32[1,1], index: 7, kind: input, shape index: {}]   ;;  %s2437_s8 = inlined_call_operand.hbm [shape: f32[1,2], index: 8, kind: output, shape index: {}]  }
   0x1   :  { %v13_v0 = vstv %s2436_s7 }
   0x2   :  { %14 = vst [vmem:[#allocation3] sm:$0x1] %v13_v0 }
   0x3   :  { %v40_v1 = vld [vmem:[%s2432_s3] sm:$0xff]  ;;  %v41_v2 = vld [vmem:[%s2432_s3 + $0x8] sm:$0xff]  ;;  %v42_v3 = vld [vmem:[%s2432_s3 + $0x10] sm:$0xff]  ;;  %v2052_v4 = vmov 0.0|0.0   ;;  %vm2053_vm0 = vmmov 0   ;;  %v2054_v7 = vmov 0.0  }
   0x4   :  { %1844 = vmatprep.subr.bf16.mxu1 %v2052_v4  ;;  %v2116_v5 = vpack.c.bf16 %v41_v2, %v40_v1  ;;  %v43_v6 = vld [vmem:[%s2432_s3 + $0x18] sm:$0xff]  ;;  %1612 = vmatprep.mubr.msk.f32.mxu1 %vm2053_vm0, %v2054_v7  ;;  %vm36_vm1 = vcmask 254976   ;;  %v2126_v8 = vld [vmem:[%s2430_s1] sm:$0x3]  ;;  %v2055_v9 = vmov 0  }
   0x5   :  { %37 = vst.msk [vmem:[#allocation2] sm:$0x3] %vm36_vm1, %v2054_v7  ;;  %38 = vst.msk [vmem:[#allocation2 + $0x2] sm:$0x3] %vm36_vm1, %v2054_v7  ;;  %1994 = vset.pattern.permute.xlu0 %v2055_v9  ;;  %vm1460_vm2 = vcmp.gt.s32.totalorder %v2126_v8, 0  ;;  %1862 = vmatprep.subr.bf16.mxu0 %v2052_v4 }
   0x6   :  { %15 = vsyncpa [#allocation5], 0  ;;  %1846 = vmatpush3.bf16.msra.mxu1 %v2116_v5  ;;  %v2136_v10 = vpack.c.bf16 %v43_v6, %v42_v3  ;;  %v72_v11 = vsel %vm1460_vm2, 1, %v2055_v9  ;;  %1864 = vmatpush3.bf16.msra.mxu0 %v2116_v5  ;;  %vm78_vm3 = vcmask 261120   ;;  %vm1467_vm4 = vcmp.gt.s32.totalorder %v2126_v8, 2  ;;  %s2056_s1 = smov 32  }
   0x7   :  { %1847 = vmatprep.subr.bf16.mxu1 %v2052_v4  ;;  %74 = vperm.xlu0 %1994, %v72_v11   ;;  %v407_v14 = vsel %vm1467_vm4, 1, %v2055_v9  ;;  %vm1471_vm5 = vcmp.gt.s32.totalorder %v2126_v8, 3  ;;  %vm1475_vm6 = vcmp.gt.s32.totalorder %v2126_v8, 4  ;;  %vm1479_vm7 = vcmp.gt.s32.totalorder %v2126_v8, 5  ;;  %v51_v20 = vld [vmem:[%s2433_s4] sm:$0xff]  ;;  %v52_v21 = vld [vmem:[%s2433_s4 + $0x8] sm:$0xff] }
   0x8   :  { %1865 = vmatprep.subr.bf16.mxu0 %v2052_v4  ;;  %1642 = vmatprep.mubr.msk.f32.mxu0 %vm2053_vm0, %v2054_v7  ;;  %v574_v15 = vsel %vm1471_vm5, 1, %v2055_v9  ;;  %v741_v16 = vsel %vm1475_vm6, 1, %v2055_v9  ;;  %v908_v17 = vsel %vm1479_vm7, 1, %v2055_v9  ;;  %vm1483_vm8 = vcmp.gt.s32.totalorder %v2126_v8, 6  ;;  %v53_v23 = vld [vmem:[%s2433_s4 + $0x10] sm:$0xff]  ;;  %v54_v24 = vld [vmem:[%s2433_s4 + $0x18] sm:$0xff] }
   0x9   :  { %1995 = vset.pattern.permute.xlu1 %v2055_v9  ;;  %v1075_v18 = vsel %vm1483_vm8, 1, %v2055_v9  ;;  %vm1487_vm9 = vcmp.gt.s32.totalorder %v2126_v8, 7  ;;  %v2174_v22 = vpack.c.bf16 %v52_v21, %v51_v20  ;;  %v2184_v25 = vpack.c.bf16 %v54_v24, %v53_v23  ;;  %v55_v26 = vld [vmem:[%s2433_s4 + $0x20] sm:$0xff]  ;;  %v56_v27 = vld [vmem:[%s2433_s4 + $0x28] sm:$0xff]  ;;  %v57_v29 = vld [vmem:[%s2433_s4 + $0x30] sm:$0xff] }
   0xa   :  { %1849 = vmatpush3.bf16.msra.mxu1 %v2136_v10  ;;  %1867 = vmatpush3.bf16.msra.mxu0 %v2136_v10  ;;  %v1242_v19 = vsel %vm1487_vm9, 1, %v2055_v9  ;;  %v2193_v28 = vpack.c.bf16 %v56_v27, %v55_v26  ;;  %v58_v30 = vld [vmem:[%s2433_s4 + $0x38] sm:$0xff]  ;;  %vm1463_vm10 = vcmp.gt.s32.totalorder %v2126_v8, 1  ;;  %v77_v33 = vld [vmem:[%s2429_s0] sm:$0x3]  ;;  %vm161_vm12 = vcmask 523264  }
   0xb   :  { %1850 = vmatprep.subr.bf16.mxu1 %v2052_v4  ;;  %1868 = vmatprep.subr.bf16.mxu0 %v2052_v4  ;;  %v2203_v31 = vpack.c.bf16 %v58_v30, %v57_v29  ;;  %v240_v32 = vsel %vm1463_vm10, 1, %v2055_v9  ;;  %v2216_v34 = vld [vmem:[%s2431_s2] ss:$0 sm:$0xff]  ;;  %v1464_v44 = vld [vmem:[%s2429_s0 + $0x2] sm:$0x3] }
   0xc   :  { %v66_v12 = vld [vmem:[#allocation2] sm:$0x3]  ;;  %v2150_v13 = vld [vmem:[#allocation2 + $0x2] sm:$0x3]  ;;  %242 = vperm.xlu1 %1995, %v240_v32   ;;  %v1468_v60 = vld [vmem:[%s2429_s0 + $0x4] sm:$0x3] }
   0xd   :  { %1613 = vmatmul.mubr.msk.f32.vlgmr.msra.gmra.mrb[0].mxu1 %vm78_vm3, %v66_v12  ;;  %157 = vrot.lane.b32.xlu0 %v2150_v13, %s2056_s1  ;;  %v2245_v45 = vld [vmem:[%s2434_s5] ss:$0 sm:$0xff] }
   0xe   :  { %1631 = vmatprep.mubr.msk.f32.mxu1 %vm2053_vm0, %v2054_v7  ;;  %1852 = vmatpush3.bf16.msra.mxu1 %v2174_v22 }
   0xf   :  { %1853 = vmatprep.subr.bf16.mxu1 %v2052_v4 }
  0x11   :  { %409 = vperm.xlu0 %1994, %v407_v14   ;;  %v1472_v14 = vld [vmem:[%s2429_s0 + $0x6] sm:$0x3] }
  0x12   :  { %1855 = vmatpush3.bf16.msra.mxu1 %v2184_v25 }
  0x13   :  { %1856 = vmatprep.subr.bf16.mxu1 %v2052_v4 }
  0x15   :  { %576 = vperm.xlu0 %1994, %v574_v15  }
  0x16   :  { %1858 = vmatpush3.bf16.msra.mxu1 %v2193_v28 }
  0x17   :  { %1859 = vmatprep.subr.bf16.mxu1 %v2052_v4 }
  0x19   :  { %743 = vperm.xlu0 %1994, %v741_v16  }
  0x1a   :  { %1861 = vmatpush3.bf16.msra.mxu1 %v2203_v31 }
  0x1b   :  { %1880 = vmatprep.subr.bf16.mxu1 %v2052_v4 }
  0x1d   :  { %910 = vperm.xlu0 %1994, %v908_v17  }
  0x21   :  { %1077 = vperm.xlu0 %1994, %v1075_v18  }
  0x25   :  { %1244 = vperm.xlu0 %1994, %v1242_v19  }
  0x86   :  { %v75_v39 = vpop.permute.xlu0 %74 }
  0x87   :  { %vm76_vm11 = vcmp.eq.s32.totalorder %v75_v39, 1 }
  0x8a   :  { %v158_v41 = vpop.permute.xlu0 %157 }
  0x8b   :  { %v243_v53 = vpop.permute.xlu1 %242 }
  0x8c   :  { %vm244_vm13 = vcmp.eq.s32.totalorder %v243_v53, 1 }
  0x90   :  { %v410_v1 = vpop.permute.xlu0 %409 }
  0x91   :  { %vm411_vm14 = vcmp.eq.s32.totalorder %v410_v1, 1 }
  0x94   :  { %v577_v21 = vpop.permute.xlu0 %576 }
  0x95   :  { %vm578_vm15 = vcmp.eq.s32.totalorder %v577_v21, 1 }
  0xe0   :  { %v148_v35 = vpop.f32.mrb[0].mxu1 }
  0xe1   :  { %v152_v36 = vadd.f32 %v148_v35, %v77_v33  ;;  %v1614_v37 = vpop.f32.mrb[1].mxu1  ;;  %v1476_v35 = vld [vmem:[%s2429_s0 + $0x8] sm:$0x3] }
  0xe3   :  { %v153_v38 = vadd.f32 %v2216_v34, %v152_v36 }
  0xe5   :  { %1996 = vtanh.f32 %v153_v38 }
  0xef   :  { %v1997_v40 = vpop.eup %1996 }
  0xf0   :  { %v155_v42 = vsel %vm76_vm11, %v1997_v40, %v66_v12 }
  0xf1   :  { %1643 = vmatmul.mubr.msk.f32.vlgmr.msra.gmra.mrb[0].mxu0 %vm78_vm3, %v155_v42  ;;  %v160_v43 = vsel %vm78_vm3, %v155_v42, %v158_v41  ;;  %v744_v41 = vpop.permute.xlu0 %743 }
  0xf2   :  { %1632 = vmatmul.mubr.msk.f32.vlgmr.msra.gmra.mrb[2].mxu1 %vm161_vm12, %v160_v43  ;;  %1870 = vmatpush3.bf16.msra.mxu0 %v2174_v22  ;;  %vm745_vm2 = vcmp.eq.s32.totalorder %v744_v41, 1  ;;  %v1429_v41 = vlaneseq }
  0xf3   :  { %1882 = vmatpush3.bf16.msra.mxu1 %v2116_v5  ;;  %1672 = vmatprep.mubr.msk.f32.mxu1 %vm2053_vm0, %v2054_v7 }
  0xf4   :  { %1883 = vmatprep.subr.bf16.mxu1 %v2052_v4  ;;  %1871 = vmatprep.subr.bf16.mxu0 %v2052_v4 }
  0xf5   :  { %1661 = vmatprep.mubr.msk.f32.mxu0 %vm2053_vm0, %v2054_v7 }
  0xf6   :  { %1873 = vmatpush3.bf16.msra.mxu0 %v2184_v25 }
  0xf7   :  { %1885 = vmatpush3.bf16.msra.mxu1 %v2136_v10  ;;  %1874 = vmatprep.subr.bf16.mxu0 %v2052_v4 }
  0xf8   :  { %1886 = vmatprep.subr.bf16.mxu1 %v2052_v4 }
  0xfa   :  { %1876 = vmatpush3.bf16.msra.mxu0 %v2193_v28 }
  0xfb   :  { %1877 = vmatprep.subr.bf16.mxu0 %v2052_v4 }
  0xfe   :  { %1879 = vmatpush3.bf16.msra.mxu0 %v2203_v31 }
  0xff   :  { %1898 = vmatprep.subr.bf16.mxu0 %v2052_v4 }
 0x1c4   :  { %v316_v46 = vpop.f32.mrb[0].mxu0 }
 0x1c5   :  { %v320_v47 = vadd.f32 %v1464_v44, %v316_v46  ;;  %v231_v48 = vpop.f32.mrb[2].mxu1  ;;  %v1644_v49 = vpop.f32.mrb[1].mxu0 }
 0x1c6   :  { %v232_v50 = vadd.f32 %v2245_v45, %v231_v48  ;;  %v1633_v51 = vpop.f32.mrb[3].mxu1 }
 0x1c7   :  { %v321_v52 = vadd.f32 %v2216_v34, %v320_v47  ;;  %v1480_v51 = vld [vmem:[%s2429_s0 + $0xa] sm:$0x3] }
 0x1c8   :  { %1998 = vtanh.f32 %v232_v50 }
 0x1c9   :  { %2000 = vtanh.f32 %v321_v52 }
 0x1d2   :  { %v1999_v54 = vpop.eup %1998 }
 0x1d3   :  { %v2001_v55 = vpop.eup %2000  ;;  %v236_v56 = vsel %vm76_vm11, %v1999_v54, %v2150_v13 }
 0x1d4   :  { %v323_v57 = vsel %vm244_vm13, %v2001_v55, %v155_v42  ;;  %325 = vrot.lane.b32.xlu1 %v236_v56, %s2056_s1 }
 0x1d5   :  { %1673 = vmatmul.mubr.msk.f32.vlgmr.msra.gmra.mrb[4].mxu1 %vm78_vm3, %v323_v57 }
 0x1d6   :  { %1888 = vmatpush3.bf16.msra.mxu1 %v2174_v22  ;;  %1691 = vmatprep.mubr.msk.f32.mxu1 %vm2053_vm0, %v2054_v7 }
 0x1d7   :  { %1889 = vmatprep.subr.bf16.mxu1 %v2052_v4 }
 0x1da   :  { %1891 = vmatpush3.bf16.msra.mxu1 %v2184_v25 }
 0x1db   :  { %1892 = vmatprep.subr.bf16.mxu1 %v2052_v4 }
 0x1de   :  { %1894 = vmatpush3.bf16.msra.mxu1 %v2193_v28 }
 0x1df   :  { %1895 = vmatprep.subr.bf16.mxu1 %v2052_v4 }
 0x1e2   :  { %1897 = vmatpush3.bf16.msra.mxu1 %v2203_v31 }
 0x1e3   :  { %1916 = vmatprep.subr.bf16.mxu1 %v2052_v4 }
 0x246   :  { %v326_v58 = vpop.permute.xlu1 %325 }
 0x247   :  { %v328_v59 = vsel %vm78_vm3, %v323_v57, %v326_v58 }
 0x248   :  { %1662 = vmatmul.mubr.msk.f32.vlgmr.msra.gmra.mrb[2].mxu0 %vm161_vm12, %v328_v59 }
 0x249   :  { %1900 = vmatpush3.bf16.msra.mxu0 %v2116_v5  ;;  %1702 = vmatprep.mubr.msk.f32.mxu0 %vm2053_vm0, %v2054_v7 }
 0x24a   :  { %1901 = vmatprep.subr.bf16.mxu0 %v2052_v4 }
 0x24d   :  { %1903 = vmatpush3.bf16.msra.mxu0 %v2136_v10 }
 0x24e   :  { %1904 = vmatprep.subr.bf16.mxu0 %v2052_v4 }
 0x2a8   :  { %v483_v61 = vpop.f32.mrb[4].mxu1 }
 0x2a9   :  { %v487_v62 = vadd.f32 %v1468_v60, %v483_v61  ;;  %v1674_v63 = vpop.f32.mrb[5].mxu1 }
 0x2ab   :  { %v488_v0 = vadd.f32 %v2216_v34, %v487_v62 }
 0x2ad   :  { %2002 = vtanh.f32 %v488_v0 }
 0x2b7   :  { %v2003_v2 = vpop.eup %2002 }
 0x2b8   :  { %v490_v3 = vsel %vm411_vm14, %v2003_v2, %v323_v57  ;;  %v911_v57 = vpop.permute.xlu0 %910  ;;  %v1484_v2 = vld [vmem:[%s2429_s0 + $0xc] sm:$0x3] }
 0x2b9   :  { %1703 = vmatmul.mubr.msk.f32.vlgmr.msra.gmra.mrb[4].mxu0 %vm78_vm3, %v490_v3  ;;  %vm912_vm4 = vcmp.eq.s32.totalorder %v911_v57, 1 }
 0x2ba   :  { %1906 = vmatpush3.bf16.msra.mxu0 %v2174_v22  ;;  %1721 = vmatprep.mubr.msk.f32.mxu0 %vm2053_vm0, %v2054_v7 }
 0x2bb   :  { %1907 = vmatprep.subr.bf16.mxu0 %v2052_v4 }
 0x2be   :  { %1909 = vmatpush3.bf16.msra.mxu0 %v2184_v25 }
 0x2bf   :  { %1910 = vmatprep.subr.bf16.mxu0 %v2052_v4 }
 0x2c2   :  { %1912 = vmatpush3.bf16.msra.mxu0 %v2193_v28 }
 0x2c3   :  { %1913 = vmatprep.subr.bf16.mxu0 %v2052_v4 }
 0x2c6   :  { %1915 = vmatpush3.bf16.msra.mxu0 %v2203_v31 }
 0x2c7   :  { %1934 = vmatprep.subr.bf16.mxu0 %v2052_v4 }
 0x31b   :  { %v398_v6 = vpop.f32.mrb[2].mxu0 }
 0x31c   :  { %v399_v8 = vadd.f32 %v2245_v45, %v398_v6  ;;  %v1663_v9 = vpop.f32.mrb[3].mxu0 }
 0x31e   :  { %2004 = vtanh.f32 %v399_v8 }
 0x328   :  { %v2005_v11 = vpop.eup %2004 }
 0x329   :  { %v403_v12 = vsel %vm244_vm13, %v2005_v11, %v236_v56 }
 0x32a   :  { %492 = vrot.lane.b32.xlu1 %v403_v12, %s2056_s1 }
 0x38c   :  { %v650_v13 = vpop.f32.mrb[4].mxu0 }
 0x38d   :  { %v1704_v15 = vpop.f32.mrb[5].mxu0  ;;  %v654_v16 = vadd.f32 %v1472_v14, %v650_v13 }
 0x38f   :  { %v655_v17 = vadd.f32 %v2216_v34, %v654_v16 }
 0x391   :  { %2006 = vtanh.f32 %v655_v17 }
 0x39b   :  { %v2007_v20 = vpop.eup %2006 }
 0x39c   :  { %v493_v18 = vpop.permute.xlu1 %492  ;;  %v657_v23 = vsel %vm578_vm15, %v2007_v20, %v490_v3 }
 0x39d   :  { %v495_v19 = vsel %vm78_vm3, %v490_v3, %v493_v18 }
 0x39e   :  { %1692 = vmatmul.mubr.msk.f32.vlgmr.msra.gmra.mrb[6].mxu1 %vm161_vm12, %v495_v19 }
 0x39f   :  { %1918 = vmatpush3.bf16.msra.mxu1 %v2116_v5  ;;  %1732 = vmatprep.mubr.msk.f32.mxu1 %vm2053_vm0, %v2054_v7 }
 0x3a0   :  { %1919 = vmatprep.subr.bf16.mxu1 %v2052_v4 }
 0x3a3   :  { %1921 = vmatpush3.bf16.msra.mxu1 %v2136_v10 }
 0x3a4   :  { %1922 = vmatprep.subr.bf16.mxu1 %v2052_v4 }
 0x3a6   :  { %1733 = vmatmul.mubr.msk.f32.vlgmr.msra.gmra.mrb[8].mxu1 %vm78_vm3, %v657_v23 }
 0x3a7   :  { %1924 = vmatpush3.bf16.msra.mxu1 %v2174_v22  ;;  %1751 = vmatprep.mubr.msk.f32.mxu1 %vm2053_vm0, %v2054_v7 }
 0x3a8   :  { %1925 = vmatprep.subr.bf16.mxu1 %v2052_v4 }
 0x3ab   :  { %1927 = vmatpush3.bf16.msra.mxu1 %v2184_v25 }
 0x3ac   :  { %1928 = vmatprep.subr.bf16.mxu1 %v2052_v4 }
 0x3af   :  { %1930 = vmatpush3.bf16.msra.mxu1 %v2193_v28 }
 0x3b0   :  { %1931 = vmatprep.subr.bf16.mxu1 %v2052_v4 }
 0x3b3   :  { %1933 = vmatpush3.bf16.msra.mxu1 %v2203_v31 }
 0x3b4   :  { %1952 = vmatprep.subr.bf16.mxu1 %v2052_v4 }
 0x471   :  { %v565_v24 = vpop.f32.mrb[6].mxu1 }
 0x472   :  { %v566_v26 = vadd.f32 %v2245_v45, %v565_v24  ;;  %v1693_v27 = vpop.f32.mrb[7].mxu1 }
 0x473   :  { %v1423_v27 = vld [vmem:[#allocation3] sm:$0x1] }
 0x474   :  { %2008 = vtanh.f32 %v566_v26 }
 0x479   :  { %v817_v29 = vpop.f32.mrb[8].mxu1 }
 0x47a   :  { %v1734_v30 = vpop.f32.mrb[9].mxu1  ;;  %v821_v36 = vadd.f32 %v1476_v35, %v817_v29 }
 0x47c   :  { %v822_v37 = vadd.f32 %v2216_v34, %v821_v36  ;;  %v1491_v36 = vld [vmem:[%s2435_s6] ss:$0 sm:$0xff] }
 0x47e   :  { %v2009_v32 = vpop.eup %2008  ;;  %2010 = vtanh.f32 %v822_v37 }
 0x47f   :  { %v570_v33 = vsel %vm411_vm14, %v2009_v32, %v403_v12  ;;  %v1078_v12 = vpop.permute.xlu0 %1077 }
 0x480   :  { %659 = vrot.lane.b32.xlu1 %v570_v33, %s2056_s1  ;;  %vm1079_vm5 = vcmp.eq.s32.totalorder %v1078_v12, 1 }
 0x488   :  { %v2011_v40 = vpop.eup %2010 }
 0x489   :  { %v824_v42 = vsel %vm745_vm2, %v2011_v40, %v657_v23 }
 0x4f2   :  { %v660_v38 = vpop.permute.xlu1 %659 }
 0x4f3   :  { %v662_v39 = vsel %vm78_vm3, %v657_v23, %v660_v38 }
 0x4f4   :  { %1722 = vmatmul.mubr.msk.f32.vlgmr.msra.gmra.mrb[6].mxu0 %vm161_vm12, %v662_v39 }
 0x4f5   :  { %1936 = vmatpush3.bf16.msra.mxu0 %v2116_v5  ;;  %1762 = vmatprep.mubr.msk.f32.mxu0 %vm2053_vm0, %v2054_v7 }
 0x4f6   :  { %1937 = vmatprep.subr.bf16.mxu0 %v2052_v4 }
 0x4f9   :  { %1939 = vmatpush3.bf16.msra.mxu0 %v2136_v10 }
 0x4fa   :  { %1940 = vmatprep.subr.bf16.mxu0 %v2052_v4 }
 0x4fc   :  { %1763 = vmatmul.mubr.msk.f32.vlgmr.msra.gmra.mrb[8].mxu0 %vm78_vm3, %v824_v42 }
 0x4fd   :  { %1942 = vmatpush3.bf16.msra.mxu0 %v2174_v22  ;;  %1781 = vmatprep.mubr.msk.f32.mxu0 %vm2053_vm0, %v2054_v7 }
 0x4fe   :  { %1943 = vmatprep.subr.bf16.mxu0 %v2052_v4 }
 0x501   :  { %1945 = vmatpush3.bf16.msra.mxu0 %v2184_v25 }
 0x502   :  { %1946 = vmatprep.subr.bf16.mxu0 %v2052_v4 }
 0x505   :  { %1948 = vmatpush3.bf16.msra.mxu0 %v2193_v28 }
 0x506   :  { %1949 = vmatprep.subr.bf16.mxu0 %v2052_v4 }
 0x509   :  { %1951 = vmatpush3.bf16.msra.mxu0 %v2203_v31 }
 0x50a   :  { %1970 = vmatprep.subr.bf16.mxu0 %v2052_v4 }
 0x5c7   :  { %v732_v43 = vpop.f32.mrb[6].mxu0 }
 0x5c8   :  { %v733_v44 = vadd.f32 %v2245_v45, %v732_v43  ;;  %v1723_v46 = vpop.f32.mrb[7].mxu0 }
 0x5ca   :  { %2012 = vtanh.f32 %v733_v44  ;;  %v1436_v44 = vand.u32 127, %v1429_v41 }
 0x5cf   :  { %v984_v47 = vpop.f32.mrb[8].mxu0 }
 0x5d0   :  { %v1764_v48 = vpop.f32.mrb[9].mxu0  ;;  %v988_v52 = vadd.f32 %v1480_v51, %v984_v47 }
 0x5d2   :  { %v989_v53 = vadd.f32 %v2216_v34, %v988_v52 }
 0x5d4   :  { %v2013_v49 = vpop.eup %2012  ;;  %2014 = vtanh.f32 %v989_v53 }
 0x5d5   :  { %v737_v50 = vsel %vm578_vm15, %v2013_v49, %v570_v33 }
 0x5d6   :  { %826 = vrot.lane.b32.xlu1 %v737_v50, %s2056_s1 }
 0x5de   :  { %v2015_v56 = vpop.eup %2014 }
 0x5df   :  { %v991_v58 = vsel %vm912_vm4, %v2015_v56, %v824_v42 }
 0x648   :  { %v827_v54 = vpop.permute.xlu1 %826 }
 0x649   :  { %v829_v55 = vsel %vm78_vm3, %v824_v42, %v827_v54  ;;  %v1430_v42 = vshrl.u32 %v1429_v41, 7 }
 0x64a   :  { %1752 = vmatmul.mubr.msk.f32.vlgmr.msra.gmra.mrb[10].mxu1 %vm161_vm12, %v829_v55 }
 0x64b   :  { %1954 = vmatpush3.bf16.msra.mxu1 %v2116_v5  ;;  %1792 = vmatprep.mubr.msk.f32.mxu1 %vm2053_vm0, %v2054_v7  ;;  %v1431_v43 = vsub.s32 0, %v1430_v42  ;;  %v1439_v47 = vsub.s32 %v1436_v44, %v1430_v42 }
 0x64c   :  { %1955 = vmatprep.subr.bf16.mxu1 %v2052_v4 }
 0x64f   :  { %1957 = vmatpush3.bf16.msra.mxu1 %v2136_v10 }
 0x650   :  { %1958 = vmatprep.subr.bf16.mxu1 %v2052_v4 }
 0x652   :  { %1793 = vmatmul.mubr.msk.f32.vlgmr.msra.gmra.mrb[12].mxu1 %vm78_vm3, %v991_v58 }
 0x653   :  { %1960 = vmatpush3.bf16.msra.mxu1 %v2174_v22  ;;  %1811 = vmatprep.mubr.msk.f32.mxu1 %vm2053_vm0, %v2054_v7 }
 0x654   :  { %1961 = vmatprep.subr.bf16.mxu1 %v2052_v4 }
 0x657   :  { %1963 = vmatpush3.bf16.msra.mxu1 %v2184_v25 }
 0x658   :  { %1964 = vmatprep.subr.bf16.mxu1 %v2052_v4 }
 0x65b   :  { %1966 = vmatpush3.bf16.msra.mxu1 %v2193_v28 }
 0x65c   :  { %1967 = vmatprep.subr.bf16.mxu1 %v2052_v4 }
 0x65f   :  { %1969 = vmatpush3.bf16.msra.mxu1 %v2203_v31 }
 0x71d   :  { %v899_v59 = vpop.f32.mrb[10].mxu1 }
 0x71e   :  { %v900_v60 = vadd.f32 %v2245_v45, %v899_v59  ;;  %v1753_v61 = vpop.f32.mrb[11].mxu1 }
 0x720   :  { %2016 = vtanh.f32 %v900_v60 }
 0x725   :  { %v1151_v62 = vpop.f32.mrb[12].mxu1 }
 0x726   :  { %v1794_v63 = vpop.f32.mrb[13].mxu1  ;;  %v1155_v3 = vadd.f32 %v1484_v2, %v1151_v62 }
 0x728   :  { %v1156_v6 = vadd.f32 %v2216_v34, %v1155_v3 }
 0x72a   :  { %v2017_v0 = vpop.eup %2016  ;;  %2018 = vtanh.f32 %v1156_v6 }
 0x72b   :  { %v904_v1 = vsel %vm745_vm2, %v2017_v0, %v737_v50 }
 0x72c   :  { %993 = vrot.lane.b32.xlu1 %v904_v1, %s2056_s1 }
 0x734   :  { %v2019_v11 = vpop.eup %2018 }
 0x735   :  { %v1158_v13 = vsel %vm1079_vm5, %v2019_v11, %v991_v58 }
 0x79e   :  { %v994_v8 = vpop.permute.xlu1 %993 }
 0x79f   :  { %v996_v9 = vsel %vm78_vm3, %v991_v58, %v994_v8 }
 0x7a0   :  { %1782 = vmatmul.mubr.msk.f32.vlgmr.msra.gmra.mrb[10].mxu0 %vm161_vm12, %v996_v9 }
 0x7a1   :  { %1972 = vmatpush3.bf16.msra.mxu0 %v2116_v5  ;;  %1822 = vmatprep.mubr.msk.f32.mxu0 %vm2053_vm0, %v2054_v7 }
 0x7a2   :  { %1973 = vmatprep.subr.bf16.mxu0 %v2052_v4 }
 0x7a5   :  { %1975 = vmatpush3.bf16.msra.mxu0 %v2136_v10 }
 0x7a6   :  { %1976 = vmatprep.subr.bf16.mxu0 %v2052_v4 }
 0x7a8   :  { %1823 = vmatmul.mubr.msk.f32.vlgmr.msra.gmra.mrb[12].mxu0 %vm78_vm3, %v1158_v13 }
 0x7a9   :  { %1978 = vmatpush3.bf16.msra.mxu0 %v2174_v22  ;;  %1841 = vmatprep.mubr.msk.f32.mxu0 %vm2053_vm0, %v2054_v7  ;;  %v1488_v7 = vld [vmem:[%s2429_s0 + $0xe] sm:$0x3] }
 0x7aa   :  { %1979 = vmatprep.subr.bf16.mxu0 %v2052_v4 }
 0x7ad   :  { %1981 = vmatpush3.bf16.msra.mxu0 %v2184_v25 }
 0x7ae   :  { %1982 = vmatprep.subr.bf16.mxu0 %v2052_v4 }
 0x7b1   :  { %1984 = vmatpush3.bf16.msra.mxu0 %v2193_v28  ;;  %v1245_v28 = vpop.permute.xlu0 %1244 }
 0x7b2   :  { %1985 = vmatprep.subr.bf16.mxu0 %v2052_v4  ;;  %vm1246_vm0 = vcmp.eq.s32.totalorder %v1245_v28, 1 }
 0x7b5   :  { %1987 = vmatpush3.bf16.msra.mxu0 %v2203_v31 }
 0x873   :  { %v1066_v5 = vpop.f32.mrb[10].mxu0 }
 0x874   :  { %v1067_v10 = vadd.f32 %v2245_v45, %v1066_v5  ;;  %v1783_v14 = vpop.f32.mrb[11].mxu0 }
 0x876   :  { %2020 = vtanh.f32 %v1067_v10 }
 0x87b   :  { %v1318_v22 = vpop.f32.mrb[12].mxu0 }
 0x87c   :  { %v1322_v15 = vadd.f32 %v1488_v7, %v1318_v22  ;;  %v1824_v25 = vpop.f32.mrb[13].mxu0 }
 0x87e   :  { %v1323_v16 = vadd.f32 %v2216_v34, %v1322_v15 }
 0x880   :  { %v2021_v17 = vpop.eup %2020  ;;  %2022 = vtanh.f32 %v1323_v16 }
 0x881   :  { %v1071_v4 = vsel %vm912_vm4, %v2021_v17, %v904_v1 }
 0x882   :  { %1160 = vrot.lane.b32.xlu1 %v1071_v4, %s2056_s1 }
 0x88a   :  { %v2023_v31 = vpop.eup %2022 }
 0x88b   :  { %v1325_v18 = vsel %vm1246_vm0, %v2023_v31, %v1158_v13 }
 0x88c   :  { %1407 = vst.msk [vmem:[#allocation2] sm:$0x3] %vm36_vm1, %v1325_v18 }
 0x8f4   :  { %v1161_v19 = vpop.permute.xlu1 %1160 }
 0x8f5   :  { %v1163_v20 = vsel %vm78_vm3, %v1158_v13, %v1161_v19 }
 0x8f6   :  { %1812 = vmatmul.mubr.msk.f32.vlgmr.msra.gmra.mrb[14].mxu1 %vm161_vm12, %v1163_v20 }
 0x9c9   :  { %v1233_v21 = vpop.f32.mrb[14].mxu1 }
 0x9ca   :  { %v1234_v34 = vadd.f32 %v2245_v45, %v1233_v21  ;;  %v1813_v23 = vpop.f32.mrb[15].mxu1 }
 0x9cc   :  { %2024 = vtanh.f32 %v1234_v34 }
 0x9d6   :  { %v2025_v24 = vpop.eup %2024 }
 0x9d7   :  { %v1238_v26 = vsel %vm1079_vm5, %v2025_v24, %v1071_v4 }
 0x9d8   :  { %1327 = vrot.lane.b32.xlu1 %v1238_v26, %s2056_s1  ;;  %s2057_s1 = smov [#allocation4]  }
 0x9d9   :  { %s1450_s25 = sshll.u32 %s2057_s1, 4  ;;  %s1451_s25 = int_to_ptr.vmem [resolvable:$true] %s1450_s25 }
 0x9da   :  { %s2028_s6 = scalar_lea.vmem %s1451_s25, 16  ;;  %s2032_s26 = scalar_lea.vmem %s1451_s25, 32 }
 0x9db   :  { %p2029_p0 = scmp.ne.s32.totalorder %s1451_s25, %s2028_s6  ;;  %p2033_p1 = scmp.lt.s32.totalorder %s1451_s25, %s1451_s25 }
 0x9dc   :  { %1426 = vperm.xlu1 %1995, %v1423_v27   ;;  %p2034_p2 = scmp.lt.s32.totalorder %s2032_s26, %s2028_s6 }
 0x9de   :  { %p2035_p3 = por %p2034_p2, %p2033_p1 }
 0x9e0   :  { %p2036_p4 = pnand %p2035_p3, %p2029_p0 }
 0xa4a   :  { %v1328_v29 = vpop.permute.xlu1 %1327 }
 0xa4b   :  { %v1330_v30 = vsel %vm78_vm3, %v1325_v18, %v1328_v29  ;;  %vm1442_vm3 = vcmask 8192  }
 0xa4c   :  { %1842 = vmatmul.mubr.msk.f32.vlgmr.msra.gmra.mrb[14].mxu0 %vm161_vm12, %v1330_v30 }
 0xb1f   :  { %v1400_v32 = vpop.f32.mrb[14].mxu0 }
 0xb20   :  { %v1401_v33 = vadd.f32 %v2245_v45, %v1400_v32  ;;  %v1843_v35 = vpop.f32.mrb[15].mxu0  ;;  %v1427_v45 = vpop.permute.xlu1 %1426 }
 0xb21   :  { %v1432_v46 = vrot.slane %v1427_v45, %v1431_v43 }
 0xb22   :  { %2026 = vtanh.f32 %v1401_v33 }
 0xb2c   :  { %v2027_v37 = vpop.eup %2026 }
 0xb2d   :  { %v1405_v38 = vsel %vm1246_vm0, %v2027_v37, %v1238_v26 }
 0xb2e   :  { %v1419_v39 = vmul.f32 %v1491_v36, %v1405_v38  ;;  %1408 = vst.msk [vmem:[#allocation2 + $0x2] sm:$0x3] %vm36_vm1, %v1405_v38 }
 0xb30   :  { %v1420_v40 = vsel %vm36_vm1, %v1419_v39, 0.0 }
 0xb31   :  { %1421 = vadd.xlane.f32.xlu0 %v1420_v40 }
 0xbbe   :  { %v1422_v48 = vpop.xlane.xlu0 %1421 }
 0xbbf   :  { %v1433_v49 = vadd.f32 %v1432_v46, %v1422_v48 }
 0xbc1   :  { %v1440_v50 = vrot.slane %v1433_v49, %v1439_v47 }
 0xbc3   :  { %1443 = vst.msk [vmem:[#allocation4] sm:$0x1] %vm1442_vm3, %v1440_v50 }
 0xbc4   :  { %2039 = shalt.err (!%p2036_p4)
}
 0xbc5   :  { %s2040_s29 = scalar_lea.hbm %s2437_s8, 16 }
 0xbc6   :  { %p2041_p5 = scmp.ne.s32.totalorder %s2437_s8, %s2040_s29  ;;  %p2044_p6 = scmp.lt.u32.totalorder %s2040_s29, %s2437_s8 }
 0xbc8   :  { %p2046_p7 = pnand %p2044_p6, %p2041_p5 }
 0xbca   :  { %2049 = shalt.err (!%p2046_p7)
}
 0xbcb   :  { %1453 = dma.vmem_to_hbm [thread:$0]  %s1451_s25, 16, %s2437_s8, [#allocation5]  }
 0xbcc   :  { %2050 = dma.done.wait [#allocation5], 16  }
 0xbcd   :  { %2051 = vsyncadd [#allocation5], 4294967280 }
 0xbce   :  { %1457 = vsyncpa [#allocation5], 1 }

</bundles_post_ra>
